<compile_context>
chip_gen: v7x
topology: tpu7x:2x2x1
jax: 0.10.0
libtpu: 0.0.40
codegen_flags: <defaults>
</compile_context>

<pallas_src>
import jax
import jax.numpy as jnp
from jax.experimental import pallas as pl
from jax.experimental.pallas import tpu as pltpu


def _make_pe(d_model: int, max_len: int, dtype=jnp.float32) -> jnp.ndarray:
    """Sinusoidal position-encoding buffer (max_len, d_model), matching the
    PyTorch __init__ (even d_model assumed, same as the reference). Stored in
    the model dtype once at init so no per-call cast is needed."""
    position = jnp.arange(0, max_len, dtype=jnp.float32)[:, None]         # (max_len, 1)
    div_term = jnp.exp(
        jnp.arange(0, d_model, 2, dtype=jnp.float32)
        * (-jnp.log(jnp.float32(10000.0)) / d_model)
    )                                                                      # (d_model/2,)
    angles = position * div_term[None, :]                                  # (max_len, d/2)
    pe = jnp.zeros((max_len, d_model), dtype=jnp.float32)
    pe = pe.at[:, 0::2].set(jnp.sin(angles))
    pe = pe.at[:, 1::2].set(jnp.cos(angles))
    return pe.astype(dtype)


def _pos_enc_kernel(x_ref, pe_ref, o_ref):
    # x_ref / o_ref: (B, TS, D) VMEM tiles; pe_ref: (TS, D).
    # Single VPU broadcast-add over the batch axis (same dtype, same layout).
    o_ref[...] = x_ref[...] + pe_ref[...][None]


def _sublane_multiple(dtype) -> int:
    """Minimum sublane tile for the dtype: 8 (32-bit), 16 (16-bit), 32 (8-bit)."""
    bits = jnp.dtype(dtype).itemsize * 8
    return max(8, 256 // bits)


def _choose_tile_rows(B: int, S: int, D: int, dtype, target_bytes: int = 4 << 20) -> int:
    """Sequence-tile rows: dtype-aware sublane multiple, x-block <= target_bytes."""
    sub = _sublane_multiple(dtype)
    itemsize = jnp.dtype(dtype).itemsize
    bytes_per_row = max(1, B * D * itemsize)          # one sequence row across batch
    max_rows = max(sub, target_bytes // bytes_per_row)
    ts = min(S, max_rows)
    ts = max(sub, (ts // sub) * sub)
    return ts


def position_encoding(x: jnp.ndarray, pe: jnp.ndarray,
                      tile_rows: int | None = None) -> jnp.ndarray:
    """x: (B, S, D), pe: (max_len, D) -> (B, S, D). Computes x + pe[None, :S]."""
    B, S, D = x.shape
    assert pe.shape[1] == D, "pe last dim must match d_model"
    assert pe.shape[0] >= S, "sequence length exceeds max_len of pe buffer"

    if pe.dtype != x.dtype:
        # Fallback only; store pe in the model dtype at init to avoid this cast.
        pe = pe.astype(x.dtype)

    sub = _sublane_multiple(x.dtype)
    ts = tile_rows if tile_rows is not None else _choose_tile_rows(B, S, D, x.dtype)
    ts = max(sub, (ts // sub) * sub)

    num_s_tiles = pl.cdiv(S, ts)

    # VMEM budget: x + out blocks double-buffered (4 * x_block), pe double-buffered
    # (2 * pe_block), plus compiler scratch slack. Cap below v7x physical VMEM.
    itemsize = jnp.dtype(x.dtype).itemsize
    x_block_bytes = B * ts * D * itemsize
    pe_block_bytes = ts * D * itemsize
    vmem_limit = int(min(48 << 20, 4 * x_block_bytes + 2 * pe_block_bytes + (4 << 20)))

    return pl.pallas_call(
        _pos_enc_kernel,
        out_shape=jax.ShapeDtypeStruct((B, S, D), x.dtype),
        grid=(num_s_tiles,),
        in_specs=[
            pl.BlockSpec((B, ts, D), lambda s: (0, s, 0)),   # x  (ragged last block OK)
            pl.BlockSpec((ts, D), lambda s: (s, 0)),         # pe (only first cdiv(S,ts) blocks read)
        ],
        out_specs=pl.BlockSpec((B, ts, D), lambda s: (0, s, 0)),
        compiler_params=pltpu.CompilerParams(
            dimension_semantics=("parallel",),
            vmem_limit_bytes=vmem_limit,
        ),
    )(x, pe)


if __name__ == "__main__":
    # Small demo shapes consistent with the module; D=128 keeps the output
    # lane-dense. pe is built once at init in the model dtype (no per-call cast).
    D = 128
    MAX_LEN = 64
    pe = _make_pe(D, MAX_LEN, dtype=jnp.float32)

    key = jax.random.PRNGKey(0)

    # Case 1: tile-aligned sequence; tile_rows=8 -> grid=(2,), batch folded in block.
    B, S = 2, 16
    x = jax.random.normal(key, (B, S, D), dtype=jnp.float32)
    out = jax.block_until_ready(position_encoding(x, pe, tile_rows=8))
    ref = x + pe[None, :S, :]
    assert out.shape == (B, S, D)
    assert jnp.allclose(out, ref, atol=1e-6), "mismatch vs reference (aligned case)"

    # Case 2: ragged last block (S % tile_rows != 0) — exercises the no-pad path.
    B2, S2 = 2, 13
    x2 = jax.random.normal(jax.random.PRNGKey(0), (B2, S2, D), dtype=jnp.float32)
    out2 = jax.block_until_ready(position_encoding(x2, pe, tile_rows=8))
    ref2 = x2 + pe[None, :S2, :]
    assert out2.shape == (B2, S2, D)
    assert jnp.allclose(out2, ref2, atol=1e-6), "mismatch vs reference (ragged case)"

    print("KERNEL_OK")
</pallas_src>

<mosaic_0001>
module attributes {stable_mosaic.version = 11 : i64} {
  func.func @_pos_enc_kernel(%arg0: i32, %arg1: memref<2x8x128xf32, #tpu.memory_space<vmem>>, %arg2: memref<8x128xf32, #tpu.memory_space<vmem>>, %arg3: memref<2x8x128xf32, #tpu.memory_space<vmem>>) attributes {dimension_semantics = [#tpu.dimension_semantics<parallel>], iteration_bounds = array<i64: 2>, scalar_prefetch = 0 : i64, scratch_operands = 0 : i64, tpu.core_type = #tpu.core_type<tc>, window_params = [{transform_indices = @transform_0, window_bounds = array<i64: 2, 8, 128>}, {transform_indices = @transform_1, window_bounds = array<i64: 8, 128>}, {transform_indices = @transform_2, window_bounds = array<i64: 2, 8, 128>}]} {
    %c0 = arith.constant 0 : index
    %c0_0 = arith.constant 0 : index
    %c0_1 = arith.constant 0 : index
    %0 = vector.load %arg1[%c0, %c0_0, %c0_1] : memref<2x8x128xf32, #tpu.memory_space<vmem>>, vector<2x8x128xf32>
    %c0_2 = arith.constant 0 : index
    %c0_3 = arith.constant 0 : index
    %1 = vector.load %arg2[%c0_2, %c0_3] : memref<8x128xf32, #tpu.memory_space<vmem>>, vector<8x128xf32>
    %2 = vector.shape_cast %1 : vector<8x128xf32> to vector<1x8x128xf32>
    %3 = vector.broadcast %2 : vector<1x8x128xf32> to vector<2x8x128xf32>
    %4 = arith.addf %0, %3 : vector<2x8x128xf32>
    %c0_4 = arith.constant 0 : index
    %c0_5 = arith.constant 0 : index
    %c0_6 = arith.constant 0 : index
    %5 = vector.load %arg3[%c0_4, %c0_5, %c0_6] : memref<2x8x128xf32, #tpu.memory_space<vmem>>, vector<2x8x128xf32>
    tpu.vector_store %arg3[%c0_4, %c0_5, %c0_6], %4 {strides = array<i32>} : memref<2x8x128xf32, #tpu.memory_space<vmem>>, vector<2x8x128xf32>,
    return
  }
  func.func @transform_0(%arg0: i32) -> (i32, i32, i32) {
    %c0_i32 = arith.constant 0 : i32
    %c0_i32_0 = arith.constant 0 : i32
    %c0_i32_1 = arith.constant 0 : i32
    return %c0_i32, %arg0, %c0_i32_0 : i32, i32, i32
  }
  func.func @transform_1(%arg0: i32) -> (i32, i32) {
    %c0_i32 = arith.constant 0 : i32
    %c0_i32_0 = arith.constant 0 : i32
    return %arg0, %c0_i32 : i32, i32
  }
  func.func @transform_2(%arg0: i32) -> (i32, i32, i32) {
    %c0_i32 = arith.constant 0 : i32
    %c0_i32_0 = arith.constant 0 : i32
    %c0_i32_1 = arith.constant 0 : i32
    return %c0_i32, %arg0, %c0_i32_0 : i32, i32, i32
  }
}

</mosaic_0001>

<bundles_post_ra>
// kernel: tpu_custom_call.1
= control target key start
LH: loop header
LB: loop body
LE: loop exit
PB: predicated region body
PF: predicated region fallthrough
CT: control target
= control target key end

     0   :  { %7 = vsyncpa [#allocation3], 0  ;;  %s751_s0 = inlined_call_operand.hbm [shape: f32[2,16,128], index: 0, kind: input, shape index: {}]   ;;  %s752_s1 = inlined_call_operand.hbm [shape: f32[64,128], index: 1, kind: input, shape index: {}]   ;;  %s753_s2 = inlined_call_operand.hbm [shape: f32[2,16,128], index: 2, kind: output, shape index: {}]  }
   0x1   :  { %9 = vsyncpa [#allocation3 + $0x1], 0 }
   0x2   :  { %10 = vsyncpa [#allocation6], 0 }
   0x3   :  { %12 = vsyncpa [#allocation6 + $0x1], 0 }
   0x4   :  { %13 = vsyncpa [#allocation4], 0 }
   0x5   :  { %15 = vsyncpa [#allocation4 + $0x1], 0  ;;  %s542_s9 = smov 0   ;;  %s544_s10 = smov 0  }
   0x6   :  { %s546_s11 = smov 0   ;;  %s548_s12 = smov 0  }
   0x7 LB: > { %s563_s13 = sadd.s32 4294967295, %s516_s12   ;;  %s314_s14 = sadd.s32 4294967294, %s516_s12   ;;  %s516_s12 = sphi %s548_s12, %s771_s12   ;;  %s512_s11 = sphi %s546_s11, %s770_s11   ;;  %s508_s10 = sphi %s544_s10, %s769_s10   ;;  %s504_s9 = sphi %s542_s9, %s768_s9  }
   0x8   : > { %s567_s15 = sadd.s32 1, %s516_s12   ;;  %s28_s16 = sadd.s32 1, %s512_s11 }
   0x9   : > { %s25_s17 = ssub.s32 %s516_s12, %s567_s15  ;;  %p35_p0 = scmp.ne.s32.totalorder %s512_s11, %s508_s10 }
   0xa   : > { %p26_p1 = scmp.eq.s32.totalorder %s25_s17, 0  ;;  %p36_p2 = scmp.eq.s32.totalorder %s516_s12, 0 }
   0xb   : > { %p41_p3 = scmp.ne.s32.totalorder %s508_s10, %s504_s9  ;;  %p42_p4 = scmp.eq.s32.totalorder %s563_s13, 0 }
   0xc   : > { %s579_s18 = scalar_select %p26_p1, %s512_s11, %s28_s16  }
   0xd   : > { %p581_p5 = por %p36_p2, %p35_p0  ;;  %p585_p6 = por %p42_p4, %p41_p3 }
   0xe   : > { %p91_p7 = scmp.eq.s32.totalorder %s563_s13, 1  ;;  %p97_p8 = scmp.eq.s32.totalorder %s314_s14, 1 }
   0xf   : > { %s757_s20 = scalar_select %p585_p6, 1, 0 }
  0x10   : > { %p346_p10 = scmp.lt.s32.totalorder %s516_s12, 2  ;;  %p592_p11 = por %p91_p7, %p35_p0 }
  0x11   : > { %p596_p12 = por %p97_p8, %p41_p3  ;;  %s601_s23 = sand.u32 1, %s512_s11  }
  0x12   : > { %s758_s21 = scalar_select %p592_p11, 1, 0 }
  0x13   : > { %s759_s22 = scalar_select %p596_p12, 1, 0 }
  0x14   : > { %s318_s24 = sshll.u32 %s516_s12, 7  ;;  %s317_s25 = sshll.u32 %s601_s23, 4 }
  0x15   : > { %s610_s28 = scalar_lea.hbm %s751_s0, %s318_s24  ;;  %s121_s29 = scalar_lea.vmem [#allocation2], %s317_s25 }
  0x16   : > { %s127_s30 = sshll.u32 %s121_s29, 4  ;;  %p614_p13 = pnand %p346_p10, %p581_p5  ;;  %s618_s30 = int_to_ptr.vmem [resolvable:$true] %s127_s30 }
  0x17   : > { %s118_s4 = scalar_lea.sflag [#allocation3], %s601_s23  ;;  %s386_s5 = scalar_lea.hbm %s610_s28, 256 }
  0x18   : > { %p387_p1 = scmp.ne.s32.totalorder %s610_s28, %s386_s5  ;;  %p388_p2 = pneg %p614_p13 }
  0x19   : > { %s391_s8 = scalar_lea.hbm %s751_s0, 512  ;;  %p392_p5 = scmp.lt.u32.totalorder %s610_s28, %s751_s0 }
  0x1a   : > { %p389_p3 = pnand %p388_p2, %p387_p1  ;;  %p393_p7 = scmp.lt.u32.totalorder %s391_s8, %s386_s5 }
  0x1b   : > { %p395_p10 = scmp.lt.u32.totalorder %s386_s5, %s610_s28 }
  0x1c   : > { %p390_p4 = pneg %p389_p3  ;;  %p394_p8 = por %p393_p7, %p392_p5 }
  0x1e   : > { %p396_p9 = por %p395_p10, %p394_p8 }
  0x20   : > { %p397_p0 = pnand %p396_p9, %p390_p4 }
  0x22   : > { %400 = shalt.err (!%p397_p0)
}
  0x23   : > { %s401_s17 = scalar_lea.vmem %s618_s30, 256  ;;  %s518_s19 = smov [#allocation2]  }
  0x24   : > { %p402_p1 = scmp.ne.s32.totalorder %s618_s30, %s401_s17  ;;  %s406_s25 = sshll.u32 %s518_s19, 4  ;;  %s407_s25 = int_to_ptr.vmem [resolvable:$false] %s406_s25 }
  0x25   : > { %s408_s26 = scalar_lea.vmem %s407_s25, 512  ;;  %p409_p11 = scmp.lt.s32.totalorder %s618_s30, %s407_s25 }
  0x26   : > { %p404_p3 = pnand %p402_p1, %p388_p2  ;;  %p410_p5 = scmp.lt.s32.totalorder %s408_s26, %s401_s17 }
  0x28   : > { %p405_p12 = pneg %p404_p3  ;;  %p411_p7 = por %p410_p5, %p409_p11 }
  0x2a   : > { %p412_p8 = pnand %p411_p7, %p405_p12 }
  0x2c   : > { %415 = shalt.err (!%p412_p8)
}
  0x2d   : > { %s519_s27 = smov 256   ;;  %s520_s29 = smov 128  }
  0x2e   : > { %s521_s5 = smov 8   ;;  %p153_p9 = scmp.lt.s32.totalorder %s516_s12, 3 }
  0x2f   : > { %338 = dma.hbm_to_vmem [thread:$0]  (!%p614_p13), %s610_s28, 256, %s618_s30, %s118_s4, %s519_s27, %s520_s29, %s521_s5  }
  0x30   : > { %s319_s6 = sshll.u32 %s601_s23, 3  ;;  %s656_s14 = scalar_lea.hbm %s752_s1, %s318_s24 }
  0x31   : > { %p761_p11 = scmp.ge.s32.totalorder %s516_s12, 1  ;;  %s141_s17 = scalar_lea.vmem [#allocation5], %s319_s6 }
  0x32   : > { %s148_s19 = sshll.u32 %s141_s17, 4  ;;  %s138_s28 = scalar_lea.sflag [#allocation6], %s601_s23  ;;  %s149_s19 = int_to_ptr.vmem [resolvable:$true] %s148_s19 }
  0x33   : > { %p660_p12 = pnand %p761_p11, %p153_p9  ;;  %s416_s30 = scalar_lea.hbm %s656_s14, 128 }
  0x34   : > { %p417_p0 = scmp.ne.s32.totalorder %s656_s14, %s416_s30  ;;  %s421_s25 = scalar_lea.hbm %s752_s1, 1024 }
  0x35   : > { %s762_s16 = scalar_select %p660_p12, 1, 0 }
  0x36   : > { %p419_p4 = pnand %p417_p0, %p388_p2  ;;  %p422_p1 = scmp.lt.u32.totalorder %s656_s14, %s752_s1 }
  0x37   : > { %p423_p3 = scmp.lt.u32.totalorder %s421_s25, %s416_s30  ;;  %p425_p7 = scmp.lt.u32.totalorder %s416_s30, %s656_s14 }
  0x38   : > { %p420_p10 = pneg %p419_p4 }
  0x39   : > { %p424_p5 = por %p423_p3, %p422_p1 }
  0x3b   : > { %p426_p8 = por %p425_p7, %p424_p5 }
  0x3d   : > { %p427_p9 = pnand %p426_p8, %p420_p10 }
  0x3f   : > { %430 = shalt.err (!%p427_p9)
}
  0x40   : > { %s431_s23 = scalar_lea.vmem %s149_s19, 128  ;;  %s522_s29 = smov [#allocation5]  }
  0x41   : > { %p432_p11 = scmp.ne.s32.totalorder %s149_s19, %s431_s23  ;;  %s436_s5 = sshll.u32 %s522_s29, 4  ;;  %s437_s5 = int_to_ptr.vmem [resolvable:$false] %s436_s5 }
  0x42   : > { %s438_s6 = scalar_lea.vmem %s437_s5, 256  ;;  %p439_p6 = scmp.lt.s32.totalorder %s149_s19, %s437_s5 }
  0x43   : > { %p434_p0 = pnand %p432_p11, %p388_p2  ;;  %p440_p12 = scmp.lt.s32.totalorder %s438_s6, %s431_s23 }
  0x45   : > { %p435_p4 = pneg %p434_p0  ;;  %p441_p1 = por %p440_p12, %p439_p6 }
  0x47   : > { %p442_p3 = pnand %p441_p1, %p435_p4 }
  0x49   : > { %445 = shalt.err (!%p442_p3)
}
  0x4a   : > { %341 = dma.hbm_to_vmem [thread:$0]  (!%p614_p13), %s656_s14, 128, %s149_s19, %s138_s28  }
  0x4b   : > { %p763_p10 = scmp.ne.s32.totalorder %s762_s16, 0 }
  0x4c   : > { %s687_s7 = sand.u32 (!%p763_p10), 1, %s508_s10   ;;  %p764_p2 = scmp.ne.s32.totalorder (!%p763_p10), %s757_s20, 0 }
  0x4d   : > { %157 = sbr.rel (%p763_p10) target bundleno = 116 (0x74), region = 28  ;;  %s322_s8 = sshll.u32 (!%p763_p10), %s687_s7, 4 }
  0x4e   : > { %s160_s17 = scalar_lea.sflag (!%p763_p10), [#allocation3], %s687_s7  ;;  %s163_s30 = scalar_lea.vmem (!%p763_p10), [#allocation2], %s322_s8 }
  0x54   : > { %491 = dma.done.wait (%p764_p2), %s160_s17, 256  }
  0x55   : > { %493 = vsyncadd (%p764_p2), %s160_s17, 4294967040  ;;  %s323_s3 = sshll.u32 %s687_s7, 3  ;;  %s169_s14 = scalar_lea.sflag [#allocation6], %s687_s7 }
  0x56   : > { %s172_s16 = scalar_lea.vmem [#allocation5], %s323_s3 }
  0x57   : > { %495 = dma.done.wait (%p764_p2), %s169_s14, 128  }
  0x58   : > { %497 = vsyncadd (%p764_p2), %s169_s14, 4294967168  ;;  %s197_s19 = scalar_lea.vmem [#allocation7], %s322_s8  ;;  %s326_s24 = sshll.u32 %s563_s13, 7  ;;  %v198_v0 = vld [vmem:[%s163_s30] sm:$0xff]  ;;  %v199_v2 = vld [vmem:[%s163_s30 + $0x8] sm:$0xff] }
  0x59   : > { %s218_s28 = sshll.u32 %s197_s19, 4  ;;  %v200_v1 = vld [vmem:[%s172_s16] sm:$0xff]  ;;  %s707_s26 = scalar_lea.hbm %s753_s2, %s326_s24  ;;  %s702_s28 = int_to_ptr.vmem [resolvable:$true] %s218_s28 }
  0x5a   : > { %v201_v3 = vadd.f32 %v200_v1, %v198_v0  ;;  %v202_v4 = vadd.f32 %v200_v1, %v199_v2  ;;  %s206_s20 = scalar_lea.sflag [#allocation4], %s687_s7  ;;  %s446_s27 = scalar_lea.vmem %s702_s28, 256 }
  0x5b   : > { %p447_p6 = scmp.ne.s32.totalorder %s702_s28, %s446_s27  ;;  %p765_p13 = scmp.ne.s32.totalorder %s758_s21, 0 }
  0x5c   : > { %203 = vst [vmem:[%s197_s19] sm:$0xff] %v201_v3  ;;  %204 = vst [vmem:[%s197_s19 + $0x8] sm:$0xff] %v202_v4  ;;  %s523_s13 = smov [#allocation7]  }
  0x5d   : > { %p448_p12 = pnand %p447_p6, %p765_p13  ;;  %s450_s23 = sshll.u32 %s523_s13, 4  ;;  %s451_s23 = int_to_ptr.vmem [resolvable:$false] %s450_s23 }
  0x5e   : > { %s452_s29 = scalar_lea.vmem %s451_s23, 512  ;;  %p453_p7 = scmp.lt.s32.totalorder %s702_s28, %s451_s23 }
  0x5f   : > { %p449_p5 = pneg %p448_p12  ;;  %p454_p8 = scmp.lt.s32.totalorder %s452_s29, %s446_s27 }
  0x61   : > { %p455_p9 = por %p454_p8, %p453_p7 }
  0x63   : > { %p456_p11 = pnand %p455_p9, %p449_p5 }
  0x65   : > { %459 = shalt.err (!%p456_p11)
}
  0x66   : > { %s460_s5 = scalar_lea.hbm %s707_s26, 256  ;;  %s464_s17 = scalar_lea.hbm %s753_s2, 512 }
  0x67   : > { %p461_p0 = scmp.ne.s32.totalorder %s707_s26, %s460_s5  ;;  %p465_p3 = scmp.lt.u32.totalorder %s707_s26, %s753_s2 }
  0x68   : > { %p466_p10 = scmp.lt.u32.totalorder %s464_s17, %s460_s5  ;;  %p468_p6 = scmp.lt.u32.totalorder %s460_s5, %s707_s26 }
  0x69   : > { %p462_p4 = pnand %p461_p0, %p765_p13 }
  0x6a   : > { %p467_p2 = por %p466_p10, %p465_p3 }
  0x6b   : > { %p463_p1 = pneg %p462_p4 }
  0x6c   : > { %p469_p12 = por %p468_p6, %p467_p2 }
  0x6e   : > { %p470_p5 = pnand %p469_p12, %p463_p1 }
  0x70   : > { %473 = shalt.err (!%p470_p5)
}
  0x71   : > { %s524_s14 = smov 128   ;;  %s525_s16 = smov 256  }
  0x72   : > { %s526_s19 = smov 8  }
  0x73   : > { %333 = dma.vmem_to_hbm [thread:$0]  (%p765_p13), %s702_s28, 256, %s707_s26, %s206_s20, %s524_s14, %s525_s16, %s526_s19  }
  0x74 PF: > { %s233_s24 = sand.u32 1, %s504_s9   ;;  %p766_p7 = scmp.ne.s32.totalorder %s759_s22, 0 }
  0x75   : > { %p767_p8 = scmp.ge.s32.totalorder %s516_s12, 2  ;;  %s234_s4 = scalar_lea.sflag [#allocation4], %s233_s24 }
  0x77   : > { %p343_p9 = pnand %p767_p8, %p766_p7 }
  0x79   : > { %499 = dma.done.wait (!%p343_p9), %s234_s4, 256  }
  0x7a   : > { %501 = vsyncadd (!%p343_p9), %s234_s4, 4294967040  ;;  %p18_p11 = scmp.ge.s32.totalorder %s567_s15, 4   ;;  %s768_s9 = smov %s508_s10 }
  0x7b   : > { %s769_s10 = smov %s512_s11  ;;  %s770_s11 = smov %s579_s18 }
  0x7c   : > { %s771_s12 = smov %s567_s15  ;;  %20 = sbr.rel (!%p18_p11) target bundleno = 7 (0x7), region = 86 }
  0x83   :  { %239 = vsyncpa [#allocation3], 1 }
  0x84   :  { %241 = vsyncpa [#allocation3 + $0x1], 1 }
  0x85   :  { %242 = vsyncpa [#allocation6], 1 }
  0x86   :  { %244 = vsyncpa [#allocation6 + $0x1], 1 }
  0x87   :  { %245 = vsyncpa [#allocation4], 1 }
  0x88   :  { %247 = vsyncpa [#allocation4 + $0x1], 1 }

</bundles_post_ra>
